<compile_context>
chip_gen: v5e
topology: v5e:2x2
jax: 0.10.0
libtpu: 0.0.40
codegen_flags: <defaults>
</compile_context>

<pallas_src>
import functools

import jax
import jax.numpy as jnp
from jax import lax
from jax.experimental import pallas as pl
from jax.experimental.pallas import tpu as pltpu


def _round_up(x, m):
    return (x + m - 1) // m * m


def _eqconv_kernel(*refs, K, Wp, TL, nT, has_bias, fold_taps):
    # refs = [w, (bias), x_hbm] + [out] + [xbuf, sem, (tap)]
    if has_bias:
        w_ref, b_ref, x_hbm, out_ref = refs[:4]
        scratch = refs[4:]
    else:
        w_ref, x_hbm, out_ref = refs[:3]
        b_ref = None
        scratch = refs[3:]
    if fold_taps:
        xbuf, sem, tap_ref = scratch
    else:
        xbuf, sem = scratch
        tap_ref = None

    bi = pl.program_id(0)            # batch index        ("parallel")
    ti = pl.program_id(1)            # spatial tile index ("arbitrary" -> sequential)
    slot = ti % 2
    Cp = xbuf.shape[1]
    win = xbuf.shape[2]

    def start_fetch(tile, s):
        off = pl.multiple_of(tile * TL, 128)   # TL is a multiple of 128
        pltpu.make_async_copy(x_hbm.at[bi, :, pl.ds(off, win)],
                              xbuf.at[s], sem.at[s]).start()

    @pl.when(ti == 0)
    def _():                          # prime the pipeline at the start of each batch
        start_fetch(ti, slot)

    @pl.when(ti + 1 < nT)
    def _():                          # prefetch next tile (same batch) into other slot
        start_fetch(ti + 1, 1 - slot)

    # Wait for the current tile's window (started at ti==0 or by step ti-1).
    pltpu.make_async_copy(x_hbm.at[bi, :, pl.ds(0, win)],
                          xbuf.at[slot], sem.at[slot]).wait()

    xw = xbuf[slot]                   # (Cp, win) flat padded-input window

    if fold_taps:
        # Fold the K*K taps into one contraction of depth K*K*Cp.
        for kh in range(K):
            for kw in range(K):
                i = kh * K + kw
                d = kh * Wp + kw                       # static flat tap offset
                tap_ref[pl.ds(i * Cp, Cp), :] = xw[:, d:d + TL]
        acc = jnp.dot(w_ref[...], tap_ref[...],
                      preferred_element_type=jnp.float32)
    else:
        acc = jnp.zeros(out_ref.shape, jnp.float32)
        for kh in range(K):
            for kw in range(K):
                d = kh * Wp + kw
                acc = acc + jnp.dot(w_ref[kh * K + kw], xw[:, d:d + TL],
                                    preferred_element_type=jnp.float32)

    if has_bias:
        acc = acc + b_ref[...]
    out_ref[...] = acc.astype(out_ref.dtype)


def equalized_conv2d(x, weight, bias=None, *, stride=1, lr_mul=1.0,
                     block_l=1024, fold_taps_max_c=256):
    """Forward of EqualizedConv2d.

    x      : (B, C, H, W)
    weight : (O, C, K, K) effective weight (already multiplied by the
             equalized-LR constant c = 1/sqrt(C*K*K) * lr_mul)
    bias   : (O,) raw bias parameter or None (module's no_bias=True);
             bias * lr_mul is applied here (hoisted out of the kernel).
    """
    B, C, H, W = x.shape
    O, Cw, K, K2 = weight.shape
    assert Cw == C and K2 == K
    dtype = x.dtype

    p = K // 2                        # PyTorch: padding = kernel_size // 2
    Hp, Wp = H + 2 * p, W + 2 * p
    H1, W1 = Hp - K + 1, Wp - K + 1   # stride-1 output dims
    L = H1 * Wp                       # flat output length (row stride Wp)
    Dh = (K - 1) * (Wp + 1)           # flat halo = max tap offset

    sub = 16 if dtype == jnp.bfloat16 else 8
    Cp = _round_up(C, sub)            # channel pad to sublane multiple
    Op = _round_up(O, 8)

    TL = min(_round_up(block_l, 128), _round_up(L, 128))
    L_pad = _round_up(L, TL)
    nT = L_pad // TL
    win = _round_up(TL + Dh, 128)     # lane-dense DMA window

    # Single pad of x: channel pad + spatial halo + extra bottom rows so the
    # flattened length covers the last tile's window (no second HBM copy).
    need = L_pad - TL + win
    extra_rows = max(0, -(-(need - Hp * Wp) // Wp))
    x_pad = jnp.pad(x, ((0, 0), (0, Cp - C), (p, p + extra_rows), (p, p)))
    x_flat = x_pad.reshape(B, Cp, -1)          # (B, Cp, >=need), stays in HBM

    # Per-tap weight layout, cast to the activation dtype (bf16 MXU fast path).
    fold_taps = (K > 1) and (C <= fold_taps_max_c)
    wt = jnp.pad(weight.transpose(2, 3, 0, 1),
                 ((0, 0), (0, 0), (0, Op - O), (0, Cp - C)))
    wt = wt.reshape(K * K, Op, Cp)
    if fold_taps:
        w_arg = wt.transpose(1, 0, 2).reshape(Op, K * K * Cp).astype(dtype)
        w_spec = pl.BlockSpec((Op, K * K * Cp), lambda bi, ti: (0, 0))
    else:
        w_arg = wt.astype(dtype)
        w_spec = pl.BlockSpec((K * K, Op, Cp), lambda bi, ti: (0, 0, 0))

    in_specs = [w_spec]
    args = [w_arg]
    has_bias = bias is not None
    if has_bias:
        b_arg = jnp.pad((bias.astype(jnp.float32) * lr_mul).reshape(O, 1),
                        ((0, Op - O), (0, 0)))
        in_specs.append(pl.BlockSpec((Op, 1), lambda bi, ti: (0, 0)))
        args.append(b_arg)
    in_specs.append(pl.BlockSpec(memory_space=pl.ANY))   # x stays in HBM
    args.append(x_flat)

    scratch = [pltpu.VMEM((2, Cp, win), dtype),          # double-buffered x window
               pltpu.SemaphoreType.DMA((2,))]
    if fold_taps:
        scratch.append(pltpu.VMEM((K * K * Cp, TL), dtype))

    kernel = functools.partial(_eqconv_kernel, K=K, Wp=Wp, TL=TL, nT=nT,
                               has_bias=has_bias, fold_taps=fold_taps)

    out = pl.pallas_call(
        kernel,
        out_shape=jax.ShapeDtypeStruct((B, Op, L_pad), dtype),
        grid_spec=pltpu.PrefetchScalarGridSpec(
            num_scalar_prefetch=0,
            grid=(B, nT),
            in_specs=in_specs,
            out_specs=pl.BlockSpec((None, Op, TL), lambda bi, ti: (bi, 0, ti)),
            scratch_shapes=scratch,
        ),
        compiler_params=pltpu.CompilerParams(
            dimension_semantics=("parallel", "arbitrary"),
            vmem_limit_bytes=64 * 1024 * 1024,
        ),
    )(*args)

    # (B, Op, L_pad) -> crop O/flat pads -> (B, O, H1, Wp) -> crop width pad.
    out = out[:, :O, :L].reshape(B, O, H1, Wp)[:, :, :, :W1]
    if stride != 1:
        # TODO(synk): tile the output directly over strided positions instead
        # of computing the full stride-1 output and subsampling (exact, but
        # stride^2 overcompute).
        out = out[:, :, ::stride, ::stride]
    return out


def _reference(x, weight, bias, stride, lr_mul):
    """Pure-JAX reference mirroring the PyTorch forward (F.conv2d)."""
    K = weight.shape[2]
    p = K // 2
    out = lax.conv_general_dilated(
        x, weight, window_strides=(stride, stride),
        padding=((p, p), (p, p)),
        dimension_numbers=("NCHW", "OIHW", "NCHW"),
        precision=lax.Precision.HIGHEST)
    if bias is not None:
        out = out + (bias * lr_mul).reshape(1, -1, 1, 1)
    return out


if __name__ == "__main__":
    B, C, H, W = 2, 4, 16, 16
    O, K = 8, 3
    lr_mul = 0.5

    key = jax.random.PRNGKey(0)
    kx, kw, kb = jax.random.split(key, 3)

    x = jax.random.normal(kx, (B, C, H, W), dtype=jnp.float32)
    # EqualizedWeight: param = randn / lr_mul ; effective = param * (1/sqrt(C*K*K) * lr_mul)
    w_param = jax.random.normal(kw, (O, C, K, K), dtype=jnp.float32) / lr_mul
    c_eq = (1.0 / jnp.sqrt(jnp.float32(C * K * K))) * lr_mul
    weight = w_param * c_eq
    bias = 0.1 * jax.random.normal(kb, (O,), dtype=jnp.float32)

    # stride = 1, folded-tap path (small C), with bias.
    out = jax.block_until_ready(
        equalized_conv2d(x, weight, bias, stride=1, lr_mul=lr_mul))
    ref = _reference(x, weight, bias, 1, lr_mul)
    assert out.shape == ref.shape, (out.shape, ref.shape)
    assert jnp.allclose(out, ref, atol=3e-4, rtol=3e-4), float(
        jnp.max(jnp.abs(out - ref)))

    # stride = 2 (wrapper subsamples the exact stride-1 result).
    out2 = jax.block_until_ready(
        equalized_conv2d(x, weight, bias, stride=2, lr_mul=lr_mul))
    ref2 = _reference(x, weight, bias, 2, lr_mul)
    assert out2.shape == ref2.shape, (out2.shape, ref2.shape)
    assert jnp.allclose(out2, ref2, atol=3e-4, rtol=3e-4)

    # per-tap-dot path (forced) + no bias (module's no_bias=True).
    out3 = jax.block_until_ready(
        equalized_conv2d(x, weight, None, stride=1, lr_mul=lr_mul,
                         fold_taps_max_c=0))
    ref3 = _reference(x, weight, None, 1, lr_mul)
    assert jnp.allclose(out3, ref3, atol=3e-4, rtol=3e-4)

    # bf16 activations: weights are cast to bf16 in the wrapper (MXU fast path).
    xb = x.astype(jnp.bfloat16)
    outb = jax.block_until_ready(
        equalized_conv2d(xb, weight, bias, stride=1, lr_mul=lr_mul))
    wb = weight.astype(jnp.bfloat16).astype(jnp.float32)
    refb = _reference(xb.astype(jnp.float32), wb, bias, 1, lr_mul)
    assert outb.dtype == jnp.bfloat16
    assert jnp.allclose(outb.astype(jnp.float32), refb, atol=5e-2, rtol=5e-2)

    print("KERNEL_OK")
</pallas_src>

<mosaic_0001>
module attributes {stable_mosaic.version = 11 : i64} {
  func.func @_eqconv_kernel(%arg0: i32, %arg1: i32, %arg2: memref<8x72xf32, #tpu.memory_space<vmem>>, %arg3: memref<8x1xf32, #tpu.memory_space<vmem>>, %arg4: memref<2x8x522xf32, #tpu.memory_space<any>>, %arg5: memref<1x8x384xf32, #tpu.memory_space<vmem>>, %arg6: memref<2x8x512xf32, #tpu.memory_space<vmem>>, %arg7: memref<2x!tpu.dma_semaphore, #tpu.memory_space<semaphore_mem>>, %arg8: memref<72x384xf32, #tpu.memory_space<vmem>>) attributes {dimension_semantics = [#tpu.dimension_semantics<parallel>, #tpu.dimension_semantics<arbitrary>], iteration_bounds = array<i64: 2, 1>, scalar_prefetch = 0 : i64, scratch_operands = 3 : i64, tpu.core_type = #tpu.core_type<tc>, window_params = [{pipeline_mode = #tpu.pipeline_mode<synchronous>, transform_indices = @transform_0, window_bounds = array<i64: 8, 72>}, {pipeline_mode = #tpu.pipeline_mode<synchronous>, transform_indices = @transform_1, window_bounds = array<i64: 8, 1>}, {}, {transform_indices = @transform_3, window_bounds = array<i64: 1, 8, 384>}]} {
    %c2_i32 = arith.constant 2 : i32
    %c0_i32 = arith.constant 0 : i32
    %0 = arith.cmpi eq, %c2_i32, %c0_i32 : i32
    %c1_i32 = arith.constant 1 : i32
    %1 = arith.select %0, %c1_i32, %c2_i32 : i32
    %2 = arith.remsi %arg1, %1 : i32
    %c0_i32_0 = arith.constant 0 : i32
    %3 = arith.cmpi ne, %2, %c0_i32_0 : i32
    %c0_i32_1 = arith.constant 0 : i32
    %4 = arith.cmpi slt, %2, %c0_i32_1 : i32
    %c0_i32_2 = arith.constant 0 : i32
    %5 = arith.cmpi slt, %1, %c0_i32_2 : i32
    %6 = arith.xori %4, %5 : i1
    %7 = arith.andi %6, %3 : i1
    %8 = arith.addi %2, %1 : i32
    %9 = arith.select %7, %8, %2 : i32
    %c0_i32_3 = arith.constant 0 : i32
    %10 = arith.cmpi eq, %arg1, %c0_i32_3 : i32
    %11 = arith.extui %10 : i1 to i32
    %c0_i32_4 = arith.constant 0 : i32
    %12 = arith.cmpi ne, %11, %c0_i32_4 : i32
    scf.if %12 {
      %c384_i32 = arith.constant 384 : i32
      %53 = arith.muli %arg1, %c384_i32 : i32
      %54 = tpu.assume_multiple %53, 128 : i32
      %c0_i32_32 = arith.constant 0 : i32
      %55 = tpu.memref_slice %arg4[%arg0, %c0_i32_32, %54] : memref<2x8x522xf32, #tpu.memory_space<any>> -> memref<1x8x512xf32, #tpu.memory_space<any>>
      %56 = tpu.memref_squeeze %55 : memref<1x8x512xf32, #tpu.memory_space<any>> -> memref<8x512xf32, #tpu.memory_space<any>>
      %c0_i32_33 = arith.constant 0 : i32
      %c0_i32_34 = arith.constant 0 : i32
      %57 = tpu.memref_slice %arg6[%9, %c0_i32_33, %c0_i32_34] : memref<2x8x512xf32, #tpu.memory_space<vmem>> -> memref<1x8x512xf32, #tpu.memory_space<vmem>>
      %58 = tpu.memref_squeeze %57 : memref<1x8x512xf32, #tpu.memory_space<vmem>> -> memref<8x512xf32, #tpu.memory_space<vmem>>
      %59 = tpu.memref_slice %arg7[%9] : memref<2x!tpu.dma_semaphore, #tpu.memory_space<semaphore_mem>> -> memref<1x!tpu.dma_semaphore, #tpu.memory_space<semaphore_mem>>
      %60 = tpu.memref_squeeze %59 : memref<1x!tpu.dma_semaphore, #tpu.memory_space<semaphore_mem>> -> memref<!tpu.dma_semaphore, #tpu.memory_space<semaphore_mem>>
      tpu.enqueue_dma source(%56 : memref<8x512xf32, #tpu.memory_space<any>>) target(%58 : memref<8x512xf32, #tpu.memory_space<vmem>>) target_semaphore(%60 : memref<!tpu.dma_semaphore, #tpu.memory_space<semaphore_mem>>)
    } else {
    }
    %c1_i32_5 = arith.constant 1 : i32
    %13 = arith.addi %arg1, %c1_i32_5 : i32
    %c1_i32_6 = arith.constant 1 : i32
    %14 = arith.cmpi slt, %13, %c1_i32_6 : i32
    %15 = arith.extui %14 : i1 to i32
    %c0_i32_7 = arith.constant 0 : i32
    %16 = arith.cmpi ne, %15, %c0_i32_7 : i32
    scf.if %16 {
      %c1_i32_32 = arith.constant 1 : i32
      %53 = arith.addi %arg1, %c1_i32_32 : i32
      %c1_i32_33 = arith.constant 1 : i32
      %54 = arith.subi %c1_i32_33, %9 : i32
      %c384_i32 = arith.constant 384 : i32
      %55 = arith.muli %53, %c384_i32 : i32
      %56 = tpu.assume_multiple %55, 128 : i32
      %c0_i32_34 = arith.constant 0 : i32
      %57 = tpu.memref_slice %arg4[%arg0, %c0_i32_34, %56] : memref<2x8x522xf32, #tpu.memory_space<any>> -> memref<1x8x512xf32, #tpu.memory_space<any>>
      %58 = tpu.memref_squeeze %57 : memref<1x8x512xf32, #tpu.memory_space<any>> -> memref<8x512xf32, #tpu.memory_space<any>>
      %c0_i32_35 = arith.constant 0 : i32
      %c0_i32_36 = arith.constant 0 : i32
      %59 = tpu.memref_slice %arg6[%54, %c0_i32_35, %c0_i32_36] : memref<2x8x512xf32, #tpu.memory_space<vmem>> -> memref<1x8x512xf32, #tpu.memory_space<vmem>>
      %60 = tpu.memref_squeeze %59 : memref<1x8x512xf32, #tpu.memory_space<vmem>> -> memref<8x512xf32, #tpu.memory_space<vmem>>
      %61 = tpu.memref_slice %arg7[%54] : memref<2x!tpu.dma_semaphore, #tpu.memory_space<semaphore_mem>> -> memref<1x!tpu.dma_semaphore, #tpu.memory_space<semaphore_mem>>
      %62 = tpu.memref_squeeze %61 : memref<1x!tpu.dma_semaphore, #tpu.memory_space<semaphore_mem>> -> memref<!tpu.dma_semaphore, #tpu.memory_space<semaphore_mem>>
      tpu.enqueue_dma source(%58 : memref<8x512xf32, #tpu.memory_space<any>>) target(%60 : memref<8x512xf32, #tpu.memory_space<vmem>>) target_semaphore(%62 : memref<!tpu.dma_semaphore, #tpu.memory_space<semaphore_mem>>)
    } else {
    }
    %c0_i32_8 = arith.constant 0 : i32
    %c0_i32_9 = arith.constant 0 : i32
    %17 = tpu.memref_slice %arg4[%arg0, %c0_i32_8, %c0_i32_9] : memref<2x8x522xf32, #tpu.memory_space<any>> -> memref<1x8x512xf32, #tpu.memory_space<any>>
    %18 = tpu.memref_squeeze %17 : memref<1x8x512xf32, #tpu.memory_space<any>> -> memref<8x512xf32, #tpu.memory_space<any>>
    %c0_i32_10 = arith.constant 0 : i32
    %c0_i32_11 = arith.constant 0 : i32
    %19 = tpu.memref_slice %arg6[%9, %c0_i32_10, %c0_i32_11] : memref<2x8x512xf32, #tpu.memory_space<vmem>> -> memref<1x8x512xf32, #tpu.memory_space<vmem>>
    %20 = tpu.memref_squeeze %19 : memref<1x8x512xf32, #tpu.memory_space<vmem>> -> memref<8x512xf32, #tpu.memory_space<vmem>>
    %21 = tpu.memref_slice %arg7[%9] : memref<2x!tpu.dma_semaphore, #tpu.memory_space<semaphore_mem>> -> memref<1x!tpu.dma_semaphore, #tpu.memory_space<semaphore_mem>>
    %22 = tpu.memref_squeeze %21 : memref<1x!tpu.dma_semaphore, #tpu.memory_space<semaphore_mem>> -> memref<!tpu.dma_semaphore, #tpu.memory_space<semaphore_mem>>
    tpu.wait_dma2 semaphore(%22 : memref<!tpu.dma_semaphore, #tpu.memory_space<semaphore_mem>>) src(%18 : memref<8x512xf32, #tpu.memory_space<any>>) dst(%20 : memref<8x512xf32, #tpu.memory_space<vmem>>)
    %23 = arith.index_cast %9 : i32 to index
    %c0 = arith.constant 0 : index
    %c0_12 = arith.constant 0 : index
    %24 = vector.load %arg6[%23, %c0, %c0_12] : memref<2x8x512xf32, #tpu.memory_space<vmem>>, vector<1x8x512xf32>
    %25 = vector.shape_cast %24 : vector<1x8x512xf32> to vector<8x512xf32>
    %26 = vector.extract_strided_slice %25 {offsets = [0, 0], sizes = [8, 384], strides = [1, 1]} : vector<8x512xf32> to vector<8x384xf32>
    %c0_13 = arith.constant 0 : index
    %c0_14 = arith.constant 0 : index
    %27 = vector.load %arg8[%c0_13, %c0_14] : memref<72x384xf32, #tpu.memory_space<vmem>>, vector<8x384xf32>
    tpu.vector_store %arg8[%c0_13, %c0_14], %26 {strides = array<i32>} : memref<72x384xf32, #tpu.memory_space<vmem>>, vector<8x384xf32>,
    %28 = vector.extract_strided_slice %25 {offsets = [0, 1], sizes = [8, 384], strides = [1, 1]} : vector<8x512xf32> to vector<8x384xf32>
    %c8 = arith.constant 8 : index
    %c0_15 = arith.constant 0 : index
    %29 = vector.load %arg8[%c8, %c0_15] : memref<72x384xf32, #tpu.memory_space<vmem>>, vector<8x384xf32>
    tpu.vector_store %arg8[%c8, %c0_15], %28 {strides = array<i32>} : memref<72x384xf32, #tpu.memory_space<vmem>>, vector<8x384xf32>,
    %30 = vector.extract_strided_slice %25 {offsets = [0, 2], sizes = [8, 384], strides = [1, 1]} : vector<8x512xf32> to vector<8x384xf32>
    %c16 = arith.constant 16 : index
    %c0_16 = arith.constant 0 : index
    %31 = vector.load %arg8[%c16, %c0_16] : memref<72x384xf32, #tpu.memory_space<vmem>>, vector<8x384xf32>
    tpu.vector_store %arg8[%c16, %c0_16], %30 {strides = array<i32>} : memref<72x384xf32, #tpu.memory_space<vmem>>, vector<8x384xf32>,
    %32 = vector.extract_strided_slice %25 {offsets = [0, 18], sizes = [8, 384], strides = [1, 1]} : vector<8x512xf32> to vector<8x384xf32>
    %c24 = arith.constant 24 : index
    %c0_17 = arith.constant 0 : index
    %33 = vector.load %arg8[%c24, %c0_17] : memref<72x384xf32, #tpu.memory_space<vmem>>, vector<8x384xf32>
    tpu.vector_store %arg8[%c24, %c0_17], %32 {strides = array<i32>} : memref<72x384xf32, #tpu.memory_space<vmem>>, vector<8x384xf32>,
    %34 = vector.extract_strided_slice %25 {offsets = [0, 19], sizes = [8, 384], strides = [1, 1]} : vector<8x512xf32> to vector<8x384xf32>
    %c32 = arith.constant 32 : index
    %c0_18 = arith.constant 0 : index
    %35 = vector.load %arg8[%c32, %c0_18] : memref<72x384xf32, #tpu.memory_space<vmem>>, vector<8x384xf32>
    tpu.vector_store %arg8[%c32, %c0_18], %34 {strides = array<i32>} : memref<72x384xf32, #tpu.memory_space<vmem>>, vector<8x384xf32>,
    %36 = vector.extract_strided_slice %25 {offsets = [0, 20], sizes = [8, 384], strides = [1, 1]} : vector<8x512xf32> to vector<8x384xf32>
    %c40 = arith.constant 40 : index
    %c0_19 = arith.constant 0 : index
    %37 = vector.load %arg8[%c40, %c0_19] : memref<72x384xf32, #tpu.memory_space<vmem>>, vector<8x384xf32>
    tpu.vector_store %arg8[%c40, %c0_19], %36 {strides = array<i32>} : memref<72x384xf32, #tpu.memory_space<vmem>>, vector<8x384xf32>,
    %38 = vector.extract_strided_slice %25 {offsets = [0, 36], sizes = [8, 384], strides = [1, 1]} : vector<8x512xf32> to vector<8x384xf32>
    %c48 = arith.constant 48 : index
    %c0_20 = arith.constant 0 : index
    %39 = vector.load %arg8[%c48, %c0_20] : memref<72x384xf32, #tpu.memory_space<vmem>>, vector<8x384xf32>
    tpu.vector_store %arg8[%c48, %c0_20], %38 {strides = array<i32>} : memref<72x384xf32, #tpu.memory_space<vmem>>, vector<8x384xf32>,
    %40 = vector.extract_strided_slice %25 {offsets = [0, 37], sizes = [8, 384], strides = [1, 1]} : vector<8x512xf32> to vector<8x384xf32>
    %c56 = arith.constant 56 : index
    %c0_21 = arith.constant 0 : index
    %41 = vector.load %arg8[%c56, %c0_21] : memref<72x384xf32, #tpu.memory_space<vmem>>, vector<8x384xf32>
    tpu.vector_store %arg8[%c56, %c0_21], %40 {strides = array<i32>} : memref<72x384xf32, #tpu.memory_space<vmem>>, vector<8x384xf32>,
    %42 = vector.extract_strided_slice %25 {offsets = [0, 38], sizes = [8, 384], strides = [1, 1]} : vector<8x512xf32> to vector<8x384xf32>
    %c64 = arith.constant 64 : index
    %c0_22 = arith.constant 0 : index
    %43 = vector.load %arg8[%c64, %c0_22] : memref<72x384xf32, #tpu.memory_space<vmem>>, vector<8x384xf32>
    tpu.vector_store %arg8[%c64, %c0_22], %42 {strides = array<i32>} : memref<72x384xf32, #tpu.memory_space<vmem>>, vector<8x384xf32>,
    %c0_23 = arith.constant 0 : index
    %c0_24 = arith.constant 0 : index
    %44 = vector.load %arg2[%c0_23, %c0_24] : memref<8x72xf32, #tpu.memory_space<vmem>>, vector<8x72xf32>
    %c0_25 = arith.constant 0 : index
    %c0_26 = arith.constant 0 : index
    %45 = vector.load %arg8[%c0_25, %c0_26] : memref<72x384xf32, #tpu.memory_space<vmem>>, vector<72x384xf32>
    %cst = arith.constant dense<0.000000e+00> : vector<8x384xf32>
    %46 = tpu.matmul %44, %45, %cst {dimension_numbers = #tpu.dot_dimension_numbers<[1], [0], [0], [1], [0, 0, 1, 1], [], []>} : vector<8x72xf32>, vector<72x384xf32>, vector<8x384xf32> -> vector<8x384xf32>
    %c0_27 = arith.constant 0 : index
    %c0_28 = arith.constant 0 : index
    %47 = vector.load %arg3[%c0_27, %c0_28] : memref<8x1xf32, #tpu.memory_space<vmem>>, vector<8x1xf32>
    %48 = vector.broadcast %47 : vector<8x1xf32> to vector<8x384xf32>
    %49 = arith.addf %46, %48 : vector<8x384xf32>
    %c0_29 = arith.constant 0 : index
    %c0_30 = arith.constant 0 : index
    %c0_31 = arith.constant 0 : index
    %50 = vector.load %arg5[%c0_29, %c0_30, %c0_31] : memref<1x8x384xf32, #tpu.memory_space<vmem>>, vector<1x8x384xf32>
    %51 = vector.shape_cast %50 : vector<1x8x384xf32> to vector<8x384xf32>
    %52 = vector.shape_cast %49 : vector<8x384xf32> to vector<1x8x384xf32>
    tpu.vector_store %arg5[%c0_29, %c0_30, %c0_31], %52 {strides = array<i32>} : memref<1x8x384xf32, #tpu.memory_space<vmem>>, vector<1x8x384xf32>,
    return
  }
  func.func @transform_0(%arg0: i32, %arg1: i32) -> (i32, i32) {
    %c0_i32 = arith.constant 0 : i32
    %c0_i32_0 = arith.constant 0 : i32
    %c0_i32_1 = arith.constant 0 : i32
    return %c0_i32, %c0_i32_0 : i32, i32
  }
  func.func @transform_1(%arg0: i32, %arg1: i32) -> (i32, i32) {
    %c0_i32 = arith.constant 0 : i32
    %c0_i32_0 = arith.constant 0 : i32
    %c0_i32_1 = arith.constant 0 : i32
    return %c0_i32, %c0_i32_0 : i32, i32
  }
  func.func @transform_3(%arg0: i32, %arg1: i32) -> (i32, i32, i32) {
    %c0_i32 = arith.constant 0 : i32
    %c0_i32_0 = arith.constant 0 : i32
    return %arg0, %c0_i32, %arg1 : i32, i32, i32
  }
}

</mosaic_0001>

<bundles_post_ra>
// kernel: tpu_custom_call.1
= control target key start
LH: loop header
LB: loop body
LE: loop exit
PB: predicated region body
PF: predicated region fallthrough
CT: control target
= control target key end

     0   :  { %8 = vsyncpa [#allocation6], 0  ;;  %s1043_s0 = inlined_call_operand.vmem [shape: f32[8,72], index: 0, kind: input, shape index: {}]   ;;  %s1044_s1 = inlined_call_operand.vmem [shape: f32[8,1], index: 1, kind: input, shape index: {}]   ;;  %s1045_s2 = inlined_call_operand.hbm [shape: f32[2,8,522], index: 2, kind: input, shape index: {}]   ;;  %s1046_s3 = inlined_call_operand.hbm [shape: f32[2,8,384], index: 3, kind: output, shape index: {}]  }
   0x1   :  { %10 = vsyncpa [#allocation6 + $0x1], 0  ;;  %s881_s12 = smov 0   ;;  %s883_s13 = smov 0  }
   0x2   :  { %s885_s14 = smov 0   ;;  %s887_s15 = smov 0  }
   0x3   :  { %s889_s16 = smov 0   ;;  %s891_s17 = smov 0  }
   0x4 LB: > { %s579_s18 = sadd.s32 4294967295, %s849_s17   ;;  %s580_s19 = sadd.s32 4294967294, %s849_s17   ;;  %s849_s17 = sphi %s891_s17, %s16_s17   ;;  %s845_s16 = sphi %s889_s16, %s1053_s16   ;;  %s841_s15 = sphi %s887_s15, %s1052_s15   ;;  %s837_s14 = sphi %s885_s14, %s1051_s14   ;;  %s833_s13 = sphi %s883_s13, %s1050_s13   ;;  %s829_s12 = sphi %s881_s12, %s1049_s12  }
   0x5   : > { %s28_s20 = sadd.s32 1, %s845_s16  ;;  %s79_s21 = sadd.s32 1, %s837_s14 }
   0x6   : > { %p30_p0 = scmp.ge.s32.totalorder %s28_s20, 2  ;;  %p89_p1 = scmp.ne.s32.totalorder %s837_s14, %s833_s13 }
   0x7   : > { %p90_p2 = scmp.eq.s32.totalorder %s579_s18, 1  ;;  %p95_p3 = scmp.ne.s32.totalorder %s833_s13, %s829_s12 }
   0x8   : > { %s1055_s20 = smov (%p30_p0, %s28_s20), 0  ;;  %p96_p5 = scmp.eq.s32.totalorder %s580_s19, 1 }
   0x9   : > { %p921_p4 = por %p90_p2, %p89_p1  ;;  %s74_s23 = ssub.s32 %s845_s16, %s1055_s20 }
   0xa   : > { %p582_p6 = scmp.ge.s32.totalorder %s849_s17, 1  ;;  %p77_p7 = scmp.eq.s32.totalorder %s74_s23, 0 }
   0xb   : > { %p928_p8 = por %p96_p5, %p95_p3  ;;  %p120_p9 = scmp.lt.s32.totalorder %s849_s17, 3 }
   0xc   : > { %s934_s25 = scalar_select %p77_p7, %s837_s14, %s79_s21  }
   0xd   : > { %p121_p10 = pnand %p582_p6, %p120_p9 }
   0xe   : > { %s134_s26 = sand.u32 (!%p121_p10), 1, %s833_s13   ;;  %s593_s27 = smul.u32 (!%p121_p10), 40, %s841_s15 }
   0xf   : > { %124 = sbr.rel (%p121_p10) target bundleno = 326 (0x146), region = 28  ;;  %s851_s5 = smov (!%p121_p10), [#allocation2]  }
  0x10   : > { %s596_s28 = smul.u32 (!%p121_p10), 24, %s134_s26  ;;  %s160_s4 = scalar_lea.hbm (!%p121_p10), %s1045_s2, %s593_s27 }
  0x11   : > { %s174_s6 = sshll.u32 (!%p121_p10), %s851_s5, 4  ;;  %s172_s7 = sshll.u32 (!%p121_p10), %s160_s4, 4  ;;  %s173_s7 = int_to_ptr.hbm [resolvable:$true] %s172_s7  ;;  %s175_s6 = int_to_ptr.vmem [resolvable:$true] %s174_s6 }
  0x12   : > { %s745_s8 = sshra.s32 (!%p121_p10), %s173_s7, 4  ;;  %s749_s18 = scalar_lea.hbm (!%p121_p10), %s1045_s2, 80  ;;  %s746_s8 = int_to_ptr.hbm [resolvable:$true] %s745_s8 }
  0x13   : > { %s747_s9 = scalar_lea.hbm (!%p121_p10), %s746_s8, 32  ;;  %p750_p12 = scmp.lt.s32.totalorder (!%p121_p10), %s746_s8, %s1045_s2 }
  0x14   : > { %p748_p11 = scmp.ne.s32.totalorder %s746_s8, %s747_s9  ;;  %p751_p13 = scmp.lt.s32.totalorder %s749_s18, %s747_s9 }
  0x16   : > { %p752_p0 = por %p751_p13, %p750_p12 }
  0x18   : > { %p753_p1 = pnand %p752_p0, %p748_p11 }
  0x1a   : > { %756 = shalt.err (!%p753_p1)  }
  0x1b   : > { %177 = dma.hbm_to_vmem [thread:$0]  %s173_s7, 512, %s175_s6, [#allocation3] }
  0x1c   : > { %s949_s23 = scalar_lea.vmem [#allocation5], %s596_s28 }
  0x1d   : > { %821 = dma.done.wait [#allocation3], 512 }
  0x1e   : > { %822 = vsyncadd [#allocation3], 4294966784  ;;  %v951_v0 = vld [vmem:[#allocation2 + $0x10] sm:$0xff]  ;;  %v219_v1 = vld [vmem:[#allocation2 + $0x18] sm:$0xff]  ;;  %s852_s27 = smov 92   ;;  %s853_s29 = smov 90  }
  0x1f   : > { %v953_v2 = vld [vmem:[#allocation2] sm:$0xff]  ;;  %v673_v3 = vpack.i.bf16 %v219_v1, %v951_v0  ;;  %v956_v4 = vld [vmem:[#allocation2 + $0x8] sm:$0xff]  ;;  %s854_s28 = smov 108   ;;  %s855_s30 = smov 91   ;;  %vm361_vm0 = vcmask 736256   ;;  %vm343_vm1 = vcmask 744448  }
  0x20   : > { %v683_v5 = vpack.i.bf16 %v956_v4, %v953_v2  ;;  %s856_s4 = smov 109   ;;  %s857_s5 = smov 110   ;;  %vm325_vm2 = vcmask 752640   ;;  %vm307_vm3 = vcmask 883712   ;;  %vm289_vm4 = vcmask 891904   ;;  %v399_v33 = vld [vmem:[%s1044_s1] sm:$0xff] }
  0x21   : > { %674 = vrot.lane.b32.xlu1 %v673_v3, %s852_s27  ;;  %664 = vrot.lane.b32.xlu0 %v673_v3, %s853_s29  ;;  %s858_s6 = smov 126   ;;  %s859_s7 = smov 127   ;;  %vm271_vm5 = vcmask 900096   ;;  %v860_v37 = vmov 0   ;;  %vm253_vm6 = vcmask 1031168   ;;  %vm235_vm7 = vcmask 1039360  }
  0x22   : > { %684 = vrot.lane.b32.xlu2 %v683_v5, %s853_s29  ;;  %743 = vset.pattern.permute.xlu1 %v860_v37  ;;  %v371_v60 = vld [vmem:[%s1043_s0] sm:$0xff]  ;;  %vm405_vm8 = vcmask 588800   ;;  %s597_s18 = smul.u32 24, %s841_s15  ;;  %s488_s29 = sshll.u32 %s949_s23, 4  ;;  %s489_s29 = int_to_ptr.vmem [resolvable:$true] %s488_s29 }
  0x23   : > { %744 = vset.pattern.permute.xlu0 %v860_v37 }
  0x29   : > { %679 = vrot.lane.b32.xlu1 %v673_v3, %s854_s28  ;;  %669 = vrot.lane.b32.xlu0 %v673_v3, %s855_s30 }
  0x2a   : > { %689 = vrot.lane.b32.xlu2 %v673_v3, %s856_s4 }
  0x31   : > { %699 = vrot.lane.b32.xlu1 %v673_v3, %s857_s5  ;;  %694 = vrot.lane.b32.xlu0 %v683_v5, %s855_s30  ;;  %s473_s30 = scalar_lea.sflag [#allocation6], %s134_s26 }
  0x32   : > { %704 = vrot.lane.b32.xlu2 %v683_v5, %s852_s27  ;;  %s486_s27 = scalar_lea.hbm %s1046_s3, %s597_s18 }
  0x39   : > { %714 = vrot.lane.b32.xlu1 %v683_v5, %s854_s28  ;;  %709 = vrot.lane.b32.xlu0 %v673_v3, %s858_s6  ;;  %s490_s28 = sshll.u32 %s486_s27, 4  ;;  %s491_s28 = int_to_ptr.hbm [resolvable:$true] %s490_s28 }
  0x3a   : > { %719 = vrot.lane.b32.xlu2 %v673_v3, %s859_s7  ;;  %s783_s15 = sshra.s32 %s491_s28, 4  ;;  %s784_s15 = int_to_ptr.hbm [resolvable:$true] %s783_s15 }
  0x3b   : > { %p790_p6 = scmp.lt.s32.totalorder %s784_s15, %s1046_s3 }
  0x41   : > { %729 = vrot.lane.b32.xlu1 %v683_v5, %s857_s5  ;;  %724 = vrot.lane.b32.xlu0 %v683_v5, %s856_s4  ;;  %s785_s4 = scalar_lea.hbm %s784_s15, 24 }
  0x42   : > { %734 = vrot.lane.b32.xlu2 %v683_v5, %s858_s6  ;;  %p786_p2 = scmp.ne.s32.totalorder %s784_s15, %s785_s4 }
  0x44   : > { %p787_p3 = pnand %p786_p2, %p921_p4 }
  0x46   : > { %p788_p5 = pneg %p787_p3 }
  0x49   : > { %739 = vrot.lane.b32.xlu0 %v683_v5, %s859_s7  ;;  %402 = vperm.xlu1 %743, %v399_v33   ;;  %s789_s7 = scalar_lea.hbm %s1046_s3, 48 }
  0x4a   : > { %p791_p7 = scmp.lt.s32.totalorder %s789_s7, %s785_s4 }
  0x4c   : > { %p792_p9 = por %p791_p7, %p790_p6 }
  0x4e   : > { %p793_p10 = pnand %p792_p9, %p788_p5 }
  0x7c   : > { %v685_v6 = vpop.permute.xlu2 %684 }
  0x7d   : > { %v687_v7 = vunpack.i.h.bf16 %v685_v6  ;;  %v686_v8 = vunpack.i.l.bf16 %v685_v6 }
  0x7f   : > { %v362_v9 = vsel %vm361_vm0, %v686_v8, %v687_v7 }
  0x80   : > { %416 = vmatpush.msra.mxu0 %v362_v9 }
  0x84   : > { %v960_v14 = vpop.permute.xlu2 %689 }
  0x85   : > { %v692_v25 = vunpack.i.h.bf16 %v960_v14  ;;  %v691_v26 = vunpack.i.l.bf16 %v960_v14 }
  0x87   : > { %v292_v32 = vsel %vm289_vm4, %v691_v26, %v692_v25 }
  0x8c   : > { %v705_v28 = vpop.permute.xlu2 %704 }
  0x8d   : > { %v706_v31 = vunpack.i.l.bf16 %v705_v28  ;;  %v707_v34 = vunpack.i.h.bf16 %v705_v28 }
  0x8f   : > { %v326_v45 = vsel %vm325_vm2, %v706_v31, %v707_v34 }
  0x93   : > { %v675_v10 = vpop.permute.xlu1 %674  ;;  %v665_v11 = vpop.permute.xlu0 %664 }
  0x94   : > { %v667_v12 = vunpack.i.h.bf16 %v665_v11  ;;  %v666_v13 = vunpack.i.l.bf16 %v665_v11  ;;  %v677_v17 = vunpack.i.h.bf16 %v675_v10  ;;  %v676_v18 = vunpack.i.l.bf16 %v675_v10  ;;  %v720_v46 = vpop.permute.xlu2 %719 }
  0x95   : > { %v722_v48 = vunpack.i.h.bf16 %v720_v46  ;;  %v721_v49 = vunpack.i.l.bf16 %v720_v46 }
  0x96   : > { %v364_v15 = vsel %vm361_vm0, %v666_v13, %v667_v12  ;;  %v363_v16 = vsel %vm361_vm0, %v687_v7, %v666_v13  ;;  %v328_v29 = vsel %vm325_vm2, %v676_v18, %v677_v17  ;;  %v327_v47 = vsel %vm325_vm2, %v707_v34, %v676_v18 }
  0x97   : > { %456 = vmatpush.msra.mxu2 %v364_v15  ;;  %436 = vmatpush.msra.mxu1 %v363_v16  ;;  %v238_v59 = vsel %vm235_vm7, %v721_v49, %v722_v48 }
  0x9b   : > { %v680_v19 = vpop.permute.xlu1 %679  ;;  %v670_v20 = vpop.permute.xlu0 %669 }
  0x9c   : > { %v682_v21 = vunpack.i.h.bf16 %v680_v19  ;;  %v681_v22 = vunpack.i.l.bf16 %v680_v19  ;;  %v672_v23 = vunpack.i.h.bf16 %v670_v20  ;;  %v671_v24 = vunpack.i.l.bf16 %v670_v20  ;;  %v735_v61 = vpop.permute.xlu2 %734 }
  0x9d   : > { %v736_v62 = vunpack.i.l.bf16 %v735_v61  ;;  %v737_v8 = vunpack.i.h.bf16 %v735_v61 }
  0x9e   : > { %v346_v27 = vsel %vm343_vm1, %v671_v24, %v672_v23  ;;  %v310_v30 = vsel %vm307_vm3, %v681_v22, %v682_v21 }
  0x9f   : > { %457 = vmatpush.msra.mxu2 %v346_v27 }
  0xa1   : > { %458 = vmatpush.msra.mxu2 %v328_v29 }
  0xa3   : > { %v700_v35 = vpop.permute.xlu1 %699  ;;  %459 = vmatpush.msra.mxu2 %v310_v30  ;;  %v695_v36 = vpop.permute.xlu0 %694 }
  0xa4   : > { %v702_v38 = vunpack.i.h.bf16 %v700_v35  ;;  %v701_v39 = vunpack.i.l.bf16 %v700_v35  ;;  %v697_v40 = vunpack.i.h.bf16 %v695_v36  ;;  %v696_v41 = vunpack.i.l.bf16 %v695_v36 }
  0xa5   : > { %460 = vmatpush.msra.mxu2 %v292_v32 }
  0xa6   : > { %v344_v42 = vsel %vm343_vm1, %v696_v41, %v697_v40  ;;  %v345_v43 = vsel %vm343_vm1, %v697_v40, %v671_v24  ;;  %v274_v44 = vsel %vm271_vm5, %v701_v39, %v702_v38 }
  0xa7   : > { %417 = vmatpush.msra.mxu0 %v344_v42  ;;  %437 = vmatpush.msra.mxu1 %v345_v43 }
  0xa8   : > { %461 = vmatpush.msra.mxu2 %v274_v44 }
  0xa9   : > { %438 = vmatpush.msra.mxu1 %v327_v47  ;;  %418 = vmatpush.msra.mxu0 %v326_v45 }
  0xab   : > { %v715_v50 = vpop.permute.xlu1 %714  ;;  %v710_v51 = vpop.permute.xlu0 %709 }
  0xac   : > { %v717_v52 = vunpack.i.h.bf16 %v715_v50  ;;  %v716_v53 = vunpack.i.l.bf16 %v715_v50  ;;  %v712_v54 = vunpack.i.h.bf16 %v710_v51  ;;  %v711_v55 = vunpack.i.l.bf16 %v710_v51 }
  0xae   : > { %v309_v56 = vsel %vm307_vm3, %v717_v52, %v681_v22  ;;  %v256_v57 = vsel %vm253_vm6, %v711_v55, %v712_v54  ;;  %v308_v58 = vsel %vm307_vm3, %v716_v53, %v717_v52  ;;  %v255_v13 = vsel %vm253_vm6, %v737_v8, %v711_v55 }
  0xaf   : > { %439 = vmatpush.msra.mxu1 %v309_v56  ;;  %462 = vmatpush.msra.mxu2 %v256_v57 }
  0xb0   : > { %419 = vmatpush.msra.mxu0 %v308_v58 }
  0xb1   : > { %463 = vmatpush.msra.mxu2 %v238_v59 }
  0xb3   : > { %v730_v63 = vpop.permute.xlu1 %729  ;;  %v725_v1 = vpop.permute.xlu0 %724  ;;  %464 = vmatpush.msra.mxu2 %v951_v0  ;;  %v254_v0 = vsel %vm253_vm6, %v736_v62, %v737_v8 }
  0xb4   : > { %v732_v3 = vunpack.i.h.bf16 %v730_v63  ;;  %v731_v5 = vunpack.i.l.bf16 %v730_v63  ;;  %v727_v6 = vunpack.i.h.bf16 %v725_v1  ;;  %v726_v7 = vunpack.i.l.bf16 %v725_v1  ;;  %587 = vmatmul.msk.f32.vlgmr.msra.gmra.mxu2 %vm405_vm8, %v371_v60 }
  0xb6   : > { %v290_v9 = vsel %vm289_vm4, %v726_v7, %v727_v6  ;;  %v291_v10 = vsel %vm289_vm4, %v727_v6, %v691_v26  ;;  %v272_v11 = vsel %vm271_vm5, %v731_v5, %v732_v3  ;;  %v273_v12 = vsel %vm271_vm5, %v732_v3, %v701_v39 }
  0xb7   : > { %420 = vmatpush.msra.mxu0 %v290_v9  ;;  %440 = vmatpush.msra.mxu1 %v291_v10 }
  0xb9   : > { %441 = vmatpush.msra.mxu1 %v273_v12  ;;  %421 = vmatpush.msra.mxu0 %v272_v11 }
  0xbb   : > { %v740_v15 = vpop.permute.xlu0 %739  ;;  %442 = vmatpush.msra.mxu1 %v255_v13  ;;  %422 = vmatpush.msra.mxu0 %v254_v0  ;;  %v403_v19 = vpop.permute.xlu1 %402 }
  0xbc   : > { %v742_v14 = vunpack.i.h.bf16 %v740_v15  ;;  %v741_v16 = vunpack.i.l.bf16 %v740_v15 }
  0xbe   : > { %v236_v17 = vsel %vm235_vm7, %v741_v16, %v742_v14  ;;  %v237_v18 = vsel %vm235_vm7, %v742_v14, %v721_v49 }
  0xbf   : > { %423 = vmatpush.msra.mxu0 %v236_v17  ;;  %443 = vmatpush.msra.mxu1 %v237_v18 }
  0xc1   : > { %424 = vmatpush.msra.mxu0 %v953_v2  ;;  %444 = vmatpush.msra.mxu1 %v956_v4 }
  0xc2   : > { %585 = vmatmul.msk.f32.vlgmr.msra.gmra.mxu0 %vm405_vm8, %v371_v60  ;;  %586 = vmatmul.msk.f32.vlgmr.msra.gmra.mxu1 %vm405_vm8, %v371_v60 }
 0x137   : > { %v466_v20 = vpop.f32.mrf.mxu2 }
 0x138   : > { %v467_v21 = vadd.f32 %v466_v20, %v403_v19 }
 0x13a   : > { %471 = vst [vmem:[%s949_s23 + $0x10] sm:$0xff] %v467_v21 }
 0x13f   : > { %v426_v2 = vpop.f32.mrf.mxu0  ;;  %v446_v4 = vpop.f32.mrf.mxu1 }
 0x140   : > { %v427_v22 = vadd.f32 %v426_v2, %v403_v19  ;;  %v447_v23 = vadd.f32 %v446_v4, %v403_v19 }
 0x142   : > { %469 = vst [vmem:[%s949_s23] sm:$0xff] %v427_v22 }
 0x143   : > { %470 = vst [vmem:[%s949_s23 + $0x8] sm:$0xff] %v447_v23 }
 0x144   : > { %796 = shalt.err (!%p793_p10)
}
 0x145   : > { %598 = dma.vmem_to_hbm [thread:$0]  (%p921_p4), %s489_s29, 384, %s491_s28, %s473_s30  }
 0x146 PF: > { %p604_p11 = scmp.ge.s32.totalorder %s849_s17, 2  ;;  %s502_s26 = sand.u32 1, %s829_s12  }
 0x147   : > { %s503_s23 = scalar_lea.sflag [#allocation6], %s502_s26 }
 0x148   : > { %p601_p12 = pnand %p604_p11, %p928_p8 }
 0x14a   : > { %p602_p13 = pneg %p601_p12 }
 0x14c   : > { %824 = dma.done.wait (%p602_p13), %s503_s23, 384  }
 0x14d   : > { %826 = vsyncadd (%p602_p13), %s503_s23, 4294966912  ;;  %s16_s17 = sadd.s32 1, %s849_s17   ;;  %s1049_s12 = smov %s833_s13 }
 0x14e   : > { %p13_p0 = scmp.ge.s32.totalorder %s16_s17, 4   ;;  %s1050_s13 = smov %s837_s14 }
 0x14f   : > { %s1051_s14 = smov %s934_s25  ;;  %s1052_s15 = smov %s845_s16 }
 0x150   : > { %s1053_s16 = smov %s1055_s20  ;;  %15 = sbr.rel (!%p13_p0) target bundleno = 4 (0x4), region = 85 }
 0x155   :  { %509 = vsyncpa [#allocation6], 1 }
 0x156   :  { %511 = vsyncpa [#allocation6 + $0x1], 1 }
 0x157   :  { %512 = vsyncmov [#allocation3] }
 0x15a   :  { %s513_s22 = vpop.sfrf %512 }
 0x15b   :  { %p591_p4 = scmp.ne.s32.totalorder %s513_s22, 0 }
 0x15d   :  { %517 = shalt.err (%p591_p4)  }
 0x15e   :  { %519 = vsyncmov [#allocation3 + $0x1] }
 0x161   :  { %s520_s24 = vpop.sfrf %519 }
 0x162   :  { %p592_p8 = scmp.ne.s32.totalorder %s520_s24, 0 }
 0x164   :  { %524 = shalt.err (%p592_p8)  }

</bundles_post_ra>
